<compile_context>
chip_gen: v7x
topology: tpu7x:2x2x1
jax: 0.10.0
libtpu: 0.0.40
codegen_flags: <defaults>
</compile_context>

<pallas_src>
import math
import numpy as np
import jax
import jax.numpy as jnp
from jax.experimental import pallas as pl
from jax.experimental.pallas import tpu as pltpu

_MiB = 1024 * 1024


def _round_up(x, m):
    return ((x + m - 1) // m) * m


def _largest_tile(size, candidates):
    for c in candidates:
        if size % c == 0:
            return c
    return candidates[-1]


def _vmem_limit(bytes_needed, floor=32 * _MiB, cap=48 * _MiB):
    # v7x has only 64 MiB VMEM per TensorCore -> keep the scoped limit <= 48 MiB.
    return int(min(cap, max(floor, (bytes_needed * 3) // 2)))


def _pick_te(E_pad, tf, budget=40 * _MiB):
    # Largest E tile for kernel A that divides E_pad and keeps the double-buffered
    # (in + out) weight tiles plus the H chunk under the VMEM budget.
    for cand in sorted({E_pad, 4096, 2048, 1024, 512, 256, 128}, reverse=True):
        if cand <= E_pad and E_pad % cand == 0:
            est = 2 * (cand * tf * 2) * 2 + 2 * (tf * tf * 2)
            if est <= budget:
                return cand
    return 128


# ----------------------------------------------------------------------------
# Kernel A: blockwise ETHER rotation applied to the transposed permuted weight
#   out[:, chunk c] = W_perm^T[:, chunk c] @ Hbd[c]^T   (bf16 in, f32 acc, bf16 out)
# ----------------------------------------------------------------------------
def _weight_rotate_kernel(wt_ref, hbdt_ref, o_ref):
    # wt_ref: (te, tf) bf16   hbdt_ref: (1, tf, tf) bf16   o_ref: (te, tf) bf16
    acc = jax.lax.dot_general(
        wt_ref[...], hbdt_ref[0],
        dimension_numbers=(((1,), (0,)), ((), ())),   # natural K-major contraction
        preferred_element_type=jnp.float32)
    o_ref[...] = acc.astype(o_ref.dtype)


def rotate_weight_t(w_perm_t_pad, hbd_t, *, te, tf):
    E_pad, F_pad = w_perm_t_pad.shape
    n_chunk = F_pad // tf
    vmem_est = 2 * (te * tf * 2) * 2 + 2 * (tf * tf * 2)
    return pl.pallas_call(
        _weight_rotate_kernel,
        out_shape=jax.ShapeDtypeStruct((E_pad, F_pad), jnp.bfloat16),
        grid=(n_chunk, E_pad // te),          # H chunk stays resident across the E loop
        in_specs=[
            pl.BlockSpec((te, tf), lambda c, e: (e, c)),
            pl.BlockSpec((1, tf, tf), lambda c, e: (c, 0, 0)),
        ],
        out_specs=pl.BlockSpec((te, tf), lambda c, e: (e, c)),
        compiler_params=pltpu.CompilerParams(
            dimension_semantics=("parallel", "parallel"),
            vmem_limit_bytes=_vmem_limit(vmem_est)),
    )(w_perm_t_pad, hbd_t)


# ----------------------------------------------------------------------------
# Kernel B: tiled linear  y = x @ W_t + bias
#   x bf16 (tm,tk), W_t bf16 (tk,tn), f32 VMEM accumulator, bias fused, bf16 out.
# ----------------------------------------------------------------------------
def _linear_kernel(x_ref, w_ref, b_ref, o_ref, acc_ref):
    @pl.when(pl.program_id(2) == 0)
    def _():
        acc_ref[...] = jnp.zeros_like(acc_ref)

    acc_ref[...] += jnp.dot(x_ref[...], w_ref[...],
                            preferred_element_type=jnp.float32)

    @pl.when(pl.program_id(2) == pl.num_programs(2) - 1)
    def _():
        o_ref[...] = (acc_ref[...] + b_ref[...]).astype(o_ref.dtype)


def linear_fwd(x_pad, w_t_pad, bias_pad, *, tm, tn, tk, out_dtype=jnp.bfloat16):
    M_pad, E_pad = x_pad.shape
    F_pad = w_t_pad.shape[1]
    grid = (M_pad // tm, F_pad // tn, E_pad // tk)
    out_bytes = jnp.dtype(out_dtype).itemsize
    vmem_est = (2 * tm * tk * 2 + 2 * tk * tn * 2 + 2 * tn * 4
                + 2 * tm * tn * out_bytes + tm * tn * 4)
    return pl.pallas_call(
        _linear_kernel,
        out_shape=jax.ShapeDtypeStruct((M_pad, F_pad), out_dtype),
        grid=grid,
        in_specs=[
            pl.BlockSpec((tm, tk), lambda i, j, k: (i, k)),
            pl.BlockSpec((tk, tn), lambda i, j, k: (k, j)),
            pl.BlockSpec((1, tn), lambda i, j, k: (0, j)),
        ],
        out_specs=pl.BlockSpec((tm, tn), lambda i, j, k: (i, j)),
        scratch_shapes=[pltpu.VMEM((tm, tn), jnp.float32)],
        compiler_params=pltpu.CompilerParams(
            dimension_semantics=("parallel", "parallel", "arbitrary"),
            vmem_limit_bytes=_vmem_limit(vmem_est)),
    )(x_pad, w_t_pad, bias_pad.reshape(1, F_pad))


# ----------------------------------------------------------------------------
# ETHERQKVLinear (Htype='ether')
# ----------------------------------------------------------------------------
class ETHERQKVLinearPallas:
    def __init__(self, in_features, out_features, n_head, n_query_groups, nb, key,
                 out_dtype=jnp.bfloat16):
        assert nb > 0
        self.in_features = in_features
        self.out_features = out_features
        self.n_head = n_head
        self.n_query_groups = n_query_groups
        self.nb = nb
        self.out_dtype = out_dtype

        self.head_embd = in_features // n_head
        self.q_per_kv = n_head // n_query_groups
        # The PyTorch reference itself raises NotImplementedError unless the q/k/v ETHER
        # head counts match, which (with q,k,v all enabled) requires q_per_kv == 1 (MHA).
        assert self.q_per_kv == 1, "kernel assumes n_head == n_query_groups (q_per_kv == 1)"
        total_qkv = self.q_per_kv + 2

        # q/k/v row indices, identical construction to the PyTorch module (kept for the
        # reference path; the forward pass uses the equivalent reshape/transpose instead).
        ind = range(out_features)
        q_ind = [x for x in ind if (x // self.head_embd) % total_qkv < total_qkv - 2]
        k_ind = [x for x in ind if (x // self.head_embd) % total_qkv == total_qkv - 2]
        v_ind = [x for x in ind if (x // self.head_embd) % total_qkv == total_qkv - 1]
        perm_np = np.array(q_ind + k_ind + v_ind, dtype=np.int32)
        assert perm_np.size == out_features          # full row permutation (q,k,v all enabled)
        self.perm = jnp.asarray(perm_np)

        # pretrained linear weights (deterministic init, torch.nn.Linear-style bounds)
        k_w, k_b, k_q, k_k, k_v = jax.random.split(key, 5)
        bound = 1.0 / math.sqrt(in_features)
        self.weight = jax.random.uniform(
            k_w, (out_features, in_features), jnp.float32, -bound, bound)
        self.bias = jax.random.uniform(
            k_b, (out_features,), jnp.float32, -bound, bound)

        # ETHER vectors (Htype='ether'); q_per_kv == 1 => embd_qkv == in_features.
        r = in_features // nb
        self.r = r
        self.Rq = jax.random.normal(k_q, (1, nb, r), jnp.float32)
        self.Rk = jax.random.normal(k_k, (1, nb, r), jnp.float32)
        self.Rv = jax.random.normal(k_v, (1, nb, r), jnp.float32)

        # ---- static layout precomputation (pretrained weight & perm are fixed) ----
        E, F = in_features, out_features
        self.tf = (r * 128) // math.gcd(r, 128)        # lcm(r, 128): whole blocks, lane dense
        self.bps = self.tf // r                        # ETHER blocks per H chunk
        F_pad = _round_up(F, self.tf)
        E_pad = _round_up(E, 128)
        self.E_pad, self.F_pad = E_pad, F_pad

        # kernel B tiles: reduction tile tk (<=512), lane-dense output tile tn (<=1024).
        # NOTE: on v6e, 2048-wide tm/tn tiles clear its ~650 flop/byte ridge; 1024 is the
        # portable choice that also fits v7x's 64 MiB VMEM with headroom.
        self.tk = _largest_tile(E_pad, (512, 256, 128))
        self.tn = _largest_tile(F_pad, (1024, 512, 256, 128))
        # kernel A E tile, decoupled from tk and as large as the VMEM budget allows.
        self.te = _pick_te(E_pad, self.tf)

        # permuted + transposed + padded pretrained weight, done ONCE (not per forward),
        # stored in bf16 so kernel A streams half the bytes and runs a single-pass MXU.
        w_perm_t = jnp.transpose(self.weight[self.perm]).astype(jnp.bfloat16)  # (E, F)
        self.w_perm_t_pad = jnp.pad(w_perm_t, ((0, E_pad - E), (0, F_pad - F)))
        self.bias_perm_pad = jnp.pad(self.bias[self.perm], (0, F_pad - F))

    # H = I - 2 R R^T / (R . R) per (qkv, block).  Tiny; JAX glue.
    # NOTE: same 1/(R.R) hazard as the PyTorch reference (no epsilon) -- kept for parity.
    def _ether_H(self, R):
        qkv, nb, r = R.shape
        I = jnp.eye(r, dtype=R.dtype)[None, None]
        RR = jnp.einsum('ijk,ijl->ijkl', R, R)
        rr = jnp.einsum('ijk,ijk->ij', R, R)
        return I - 2.0 * RR / rr[..., None, None]

    # (G, r, r) H blocks -> transposed block-diagonal chunks (n_chunk, tf, tf), bf16.
    # TODO(synk): when bps > 1 (r < 128) only 1/bps of each chunk is nonzero; a batched
    # per-block dot_general would avoid the bps-fold MXU/DMA waste (low priority,
    # kernel A is amortized over M).
    def _block_diag_chunks_T(self, H_flat):
        G = H_flat.shape[0]
        bps, tf, r = self.bps, self.tf, self.r
        n_chunk = self.F_pad // tf
        Hp = jnp.pad(H_flat, ((0, n_chunk * bps - G), (0, 0), (0, 0)))
        Hp = Hp.reshape(n_chunk, bps, r, r)
        eye = jnp.eye(bps, dtype=Hp.dtype)
        # hbd[c, i*r+a, j*r+b] = (i == j) * H[c*bps+i, a, b]
        hbd = eye[None, :, None, :, None] * Hp[:, :, :, None, :]
        hbd = hbd.reshape(n_chunk, tf, tf)
        return jnp.swapaxes(hbd, -1, -2).astype(jnp.bfloat16)

    def forward(self, x):
        B, T, E = x.shape
        assert E == self.in_features
        F, E_pad, F_pad = self.out_features, self.E_pad, self.F_pad
        G = 3 * self.nb

        # --- ETHER rotation of the (permuted, transposed) pretrained weight ---
        R = jnp.concatenate([self.Rq, self.Rk, self.Rv], axis=0)    # (3, nb, r)
        H_flat = self._ether_H(R).reshape(G, self.r, self.r)

        if self.tf <= 2048:
            hbd_t = self._block_diag_chunks_T(H_flat)
            w_new_t = rotate_weight_t(self.w_perm_t_pad, hbd_t, te=self.te, tf=self.tf)
        else:
            # TODO(synk): for very large per-block size r the dense (tf, tf) H chunk would
            # not fit VMEM; fall back to an XLA einsum for that rare configuration.
            wt = self.w_perm_t_pad[:, :F].astype(jnp.float32).reshape(E_pad, G, self.r)
            wt = jnp.einsum('egn,gmn->egm', wt, H_flat)
            w_new_t = jnp.pad(wt.reshape(E_pad, F),
                              ((0, 0), (0, F_pad - F))).astype(jnp.bfloat16)

        # --- y_perm = dropout(x) @ W_new_perm^T + bias_perm  (dropout p=0 -> identity) ---
        M = B * T
        M_pad = _round_up(M, 128)                       # 128-row tiles (bf16 packing)
        tm = _largest_tile(M_pad, (1024, 512, 256, 128))
        x_pad = jnp.pad(x.reshape(M, E).astype(jnp.bfloat16),
                        ((0, M_pad - M), (0, E_pad - E)))

        # TODO(synk): when M_pad // tm <= 2 (decode regime) kernel B is weight-streaming
        # bound; fuse the block-diagonal rotation into kernel B's weight tile (or cache
        # w_new_t across forwards when R is unchanged) to kill the weight's extra HBM trip.
        y_perm = linear_fwd(x_pad, w_new_t, self.bias_perm_pad,
                            tm=tm, tn=self.tn, tk=self.tk, out_dtype=self.out_dtype)

        # Undo padding and the q/k/v row permutation.  The permutation is exactly the
        # (3, n_head) <-> (n_head, 3) head-block interleave, so a reshape/transpose
        # replaces the former worst-case lane-dimension gather.
        # TODO(synk): fold this into kernel B's out_specs index_map (tn = head_embd) when
        # head_embd % 128 == 0, removing the extra HBM pass entirely.
        he = self.head_embd
        y = y_perm[:M, :F].reshape(M, 3, self.n_head, he)
        y = jnp.transpose(y, (0, 2, 1, 3)).reshape(M, F)
        return y.reshape(B, T, F)


# ----------------------------------------------------------------------------
# Pure-JAX reference (mirrors the PyTorch forward) for verification
# ----------------------------------------------------------------------------
def reference_forward(x, weight, bias, Rq, Rk, Rv, perm):
    R = jnp.concatenate([Rq, Rk, Rv], axis=0)
    qkv, nb, r = R.shape
    I = jnp.eye(r, dtype=R.dtype)[None, None]
    RR = jnp.einsum('ijk,ijl->ijkl', R, R)
    rr = jnp.einsum('ijk,ijk->ij', R, R)
    H = I - 2.0 * RR / rr[..., None, None]

    filt = weight[perm]
    f, d = filt.shape
    filt = filt.reshape(qkv, nb, f // qkv // nb, d)
    filt = jnp.einsum('qrmn,qrnd->qrmd', H, filt)
    filt = filt.reshape(f, d)
    new_filt = weight.at[perm].set(filt)
    return jnp.einsum('bte,fe->btf', x, new_filt) + bias


if __name__ == "__main__":
    # Small shapes: embedding 32, 4 heads (MHA => q_per_kv == 1), nb=4 blocks.
    in_features = 32
    n_head = 4
    n_query_groups = 4
    head_embd = in_features // n_head
    out_features = (n_head // n_query_groups + 2) * n_query_groups * head_embd  # 96
    nb = 4
    B, T = 2, 8

    key = jax.random.PRNGKey(0)
    k_mod, k_x = jax.random.split(key)
    module = ETHERQKVLinearPallas(in_features, out_features, n_head,
                                  n_query_groups, nb, k_mod)
    x = jax.random.normal(k_x, (B, T, in_features), jnp.float32)

    y = jax.block_until_ready(module.forward(x))

    y_ref = reference_forward(x, module.weight, module.bias,
                              module.Rq, module.Rk, module.Rv, module.perm)
    # bf16 operands / bf16 output with f32 accumulation vs. f32 reference.
    np.testing.assert_allclose(np.asarray(y.astype(jnp.float32)), np.asarray(y_ref),
                               rtol=3e-2, atol=3e-2)
    assert y.shape == (B, T, out_features)
    print("KERNEL_OK")
</pallas_src>

<mosaic_0001>
module attributes {stable_mosaic.version = 11 : i64} {
  func.func @_weight_rotate_kernel(%arg0: i32, %arg1: i32, %arg2: memref<128x128xbf16, #tpu.memory_space<vmem>>, %arg3: memref<1x128x128xbf16, #tpu.memory_space<vmem>>, %arg4: memref<128x128xbf16, #tpu.memory_space<vmem>>) attributes {dimension_semantics = [#tpu.dimension_semantics<parallel>, #tpu.dimension_semantics<parallel>], iteration_bounds = array<i64: 1, 1>, scalar_prefetch = 0 : i64, scratch_operands = 0 : i64, tpu.core_type = #tpu.core_type<tc>, window_params = [{transform_indices = @transform_0, window_bounds = array<i64: 128, 128>}, {transform_indices = @transform_1, window_bounds = array<i64: 1, 128, 128>}, {transform_indices = @transform_2, window_bounds = array<i64: 128, 128>}]} {
    %c0 = arith.constant 0 : index
    %c0_0 = arith.constant 0 : index
    %0 = vector.load %arg2[%c0, %c0_0] : memref<128x128xbf16, #tpu.memory_space<vmem>>, vector<128x128xbf16>
    %c0_1 = arith.constant 0 : index
    %c0_2 = arith.constant 0 : index
    %c0_3 = arith.constant 0 : index
    %1 = vector.load %arg3[%c0_1, %c0_2, %c0_3] : memref<1x128x128xbf16, #tpu.memory_space<vmem>>, vector<1x128x128xbf16>
    %2 = vector.shape_cast %1 : vector<1x128x128xbf16> to vector<128x128xbf16>
    %cst = arith.constant dense<0.000000e+00> : vector<128x128xf32>
    %3 = tpu.matmul %0, %2, %cst {dimension_numbers = #tpu.dot_dimension_numbers<[1], [0], [0], [1], [0, 0, 1, 1], [], []>} : vector<128x128xbf16>, vector<128x128xbf16>, vector<128x128xf32> -> vector<128x128xf32>
    %4 = arith.truncf %3 : vector<128x128xf32> to vector<128x128xbf16>
    %c0_4 = arith.constant 0 : index
    %c0_5 = arith.constant 0 : index
    %5 = vector.load %arg4[%c0_4, %c0_5] : memref<128x128xbf16, #tpu.memory_space<vmem>>, vector<128x128xbf16>
    tpu.vector_store %arg4[%c0_4, %c0_5], %4 {strides = array<i32>} : memref<128x128xbf16, #tpu.memory_space<vmem>>, vector<128x128xbf16>,
    return
  }
  func.func @transform_0(%arg0: i32, %arg1: i32) -> (i32, i32) {
    %c0_i32 = arith.constant 0 : i32
    return %arg1, %arg0 : i32, i32
  }
  func.func @transform_1(%arg0: i32, %arg1: i32) -> (i32, i32, i32) {
    %c0_i32 = arith.constant 0 : i32
    %c0_i32_0 = arith.constant 0 : i32
    %c0_i32_1 = arith.constant 0 : i32
    return %arg0, %c0_i32, %c0_i32_0 : i32, i32, i32
  }
  func.func @transform_2(%arg0: i32, %arg1: i32) -> (i32, i32) {
    %c0_i32 = arith.constant 0 : i32
    return %arg1, %arg0 : i32, i32
  }
}

</mosaic_0001>

<bundles_post_ra>
// kernel: tpu_custom_call.1
= control target key start
LH: loop header
LB: loop body
LE: loop exit
PB: predicated region body
PF: predicated region fallthrough
CT: control target
= control target key end

     0   :  { %7 = vsyncpa [#allocation3], 0  ;;  %s681_s0 = inlined_call_operand.hbm [shape: bf16[128,128], index: 0, kind: input, shape index: {}]   ;;  %s682_s1 = inlined_call_operand.hbm [shape: bf16[1,128,128], index: 1, kind: input, shape index: {}]   ;;  %s683_s2 = inlined_call_operand.hbm [shape: bf16[128,128], index: 2, kind: output, shape index: {}]  }
   0x1   :  { %8 = vsyncpa [#allocation6], 0 }
   0x2   :  { %9 = vsyncpa [#allocation4], 0  ;;  %s616_s9 = smov [#allocation2]   ;;  %s544_s13 = scalar_lea.hbm %s681_s0, 1024 }
   0x3   :  { %s15_s10 = sshll.u32 %s616_s9, 4  ;;  %p545_p0 = scmp.ne.s32.totalorder %s681_s0, %s544_s13  ;;  %s16_s10 = int_to_ptr.vmem [resolvable:$true] %s15_s10 }
   0x4   :  { %p548_p1 = scmp.lt.u32.totalorder %s544_s13, %s681_s0 }
   0x6   :  { %p550_p2 = pnand %p548_p1, %p545_p0 }
   0x8   :  { %553 = shalt.err (!%p550_p2)
}
   0x9   :  { %s554_s18 = scalar_lea.vmem %s16_s10, 1024  ;;  %p559_p4 = scmp.lt.s32.totalorder %s16_s10, %s16_s10 }
   0xa   :  { %p555_p3 = scmp.ne.s32.totalorder %s16_s10, %s554_s18  ;;  %p560_p5 = scmp.lt.s32.totalorder %s554_s18, %s554_s18 }
   0xc   :  { %p561_p6 = por %p560_p5, %p559_p4 }
   0xe   :  { %p562_p7 = pnand %p561_p6, %p555_p3 }
  0x10   :  { %565 = shalt.err (!%p562_p7)
}
  0x11   :  { %s617_s19 = smov 64   ;;  %s618_s20 = smov 4  }
  0x12   :  { %21 = dma.hbm_to_vmem [thread:$0]  %s681_s0, 1024, %s16_s10, [#allocation3], %s617_s19, %s617_s19, %s618_s20  }
  0x13   :  { %s619_s23 = smov [#allocation5]   ;;  %s566_s27 = scalar_lea.hbm %s682_s1, 1024 }
  0x14   :  { %s27_s24 = sshll.u32 %s619_s23, 4  ;;  %p567_p8 = scmp.ne.s32.totalorder %s682_s1, %s566_s27  ;;  %s28_s24 = int_to_ptr.vmem [resolvable:$true] %s27_s24 }
  0x15   :  { %p570_p9 = scmp.lt.u32.totalorder %s566_s27, %s682_s1 }
  0x17   :  { %p572_p10 = pnand %p570_p9, %p567_p8 }
  0x19   :  { %575 = shalt.err (!%p572_p10)
}
  0x1a   :  { %s576_s4 = scalar_lea.vmem %s28_s24, 1024  ;;  %p581_p12 = scmp.lt.s32.totalorder %s28_s24, %s28_s24 }
  0x1b   :  { %p577_p11 = scmp.ne.s32.totalorder %s28_s24, %s576_s4  ;;  %p582_p13 = scmp.lt.s32.totalorder %s576_s4, %s576_s4 }
  0x1d   :  { %p583_p0 = por %p582_p13, %p581_p12 }
  0x1f   :  { %p584_p1 = pnand %p583_p0, %p577_p11 }
  0x21   :  { %587 = shalt.err (!%p584_p1)
}
  0x22   :  { %33 = dma.hbm_to_vmem [thread:$0]  %s682_s1, 1024, %s28_s24, [#allocation6], %s617_s19, %s617_s19, %s618_s20  }
  0x23   :  { %610 = dma.done.wait [#allocation3], 1024  }
  0x24   :  { %611 = vsyncadd [#allocation3], 4294966272 }
  0x25   :  { %612 = dma.done.wait [#allocation6], 1024  }
  0x26   :  { %613 = vsyncadd [#allocation6], 4294966272  ;;  %v528_v0 = vld [vmem:[#allocation5] sm:$0xff]   ;;  %v529_v1 = vld [vmem:[#allocation5 + $0x8] sm:$0xff]   ;;  %s620_s1 = smov [#allocation7]  }
  0x27   :  { %475 = vmatprep.subr.bf16.mxu0 %v528_v0  ;;  %507 = vmatprep.subr.bf16.mxu1 %v528_v0  ;;  %v530_v2 = vld [vmem:[#allocation5 + $0x10] sm:$0xff]   ;;  %v531_v3 = vld [vmem:[#allocation5 + $0x18] sm:$0xff]   ;;  %v536_v4 = vld [vmem:[#allocation2] sm:$0xff]   ;;  %s351_s6 = sshll.u32 %s620_s1, 4  ;;  %s352_s6 = int_to_ptr.vmem [resolvable:$true] %s351_s6 }
  0x28   :  { %476 = vmatpush3.bf16.msra.mxu0 %v528_v0  ;;  %515 = vmatpush3.bf16.msra.mxu1 %v528_v0  ;;  %v537_v5 = vld [vmem:[#allocation2 + $0x20] sm:$0xff]   ;;  %v533_v7 = vld [vmem:[#allocation5 + $0x28] sm:$0xff]   ;;  %v534_v8 = vld [vmem:[#allocation5 + $0x30] sm:$0xff]   ;;  %s588_s7 = scalar_lea.vmem %s352_s6, 1024  ;;  %p593_p3 = scmp.lt.s32.totalorder %s352_s6, %s352_s6 }
  0x29   :  { %477 = vmatprep.subr.bf16.mxu0 %v529_v1  ;;  %508 = vmatprep.subr.bf16.mxu1 %v529_v1  ;;  %v532_v6 = vld [vmem:[#allocation5 + $0x20] sm:$0xff]   ;;  %v535_v9 = vld [vmem:[#allocation5 + $0x38] sm:$0xff]   ;;  %v538_v10 = vld [vmem:[#allocation2 + $0x8] sm:$0xff]   ;;  %p589_p2 = scmp.ne.s32.totalorder %s352_s6, %s588_s7  ;;  %p594_p4 = scmp.lt.s32.totalorder %s588_s7, %s588_s7 }
  0x2a   :  { %491 = vmatprep.mubr.bf16.mxu0 %v536_v4  ;;  %499 = vmatprep.mubr.bf16.mxu1 %v537_v5  ;;  %v539_v11 = vld [vmem:[#allocation2 + $0x28] sm:$0xff]   ;;  %v540_v12 = vld [vmem:[#allocation2 + $0x10] sm:$0xff]   ;;  %v542_v14 = vld [vmem:[#allocation2 + $0x18] sm:$0xff]  }
  0x2b   :  { %v541_v13 = vld [vmem:[#allocation2 + $0x30] sm:$0xff]   ;;  %v543_v15 = vld [vmem:[#allocation2 + $0x38] sm:$0xff]   ;;  %p595_p5 = por %p594_p4, %p593_p3 }
  0x2c   :  { %478 = vmatpush3.bf16.msra.mxu0 %v529_v1  ;;  %516 = vmatpush3.bf16.msra.mxu1 %v529_v1 }
  0x2d   :  { %479 = vmatprep.subr.bf16.mxu0 %v530_v2  ;;  %509 = vmatprep.subr.bf16.mxu1 %v530_v2  ;;  %p596_p6 = pnand %p595_p5, %p589_p2 }
  0x30   :  { %480 = vmatpush3.bf16.msra.mxu0 %v530_v2  ;;  %517 = vmatpush3.bf16.msra.mxu1 %v530_v2 }
  0x31   :  { %481 = vmatprep.subr.bf16.mxu0 %v531_v3  ;;  %510 = vmatprep.subr.bf16.mxu1 %v531_v3 }
  0x34   :  { %482 = vmatpush3.bf16.msra.mxu0 %v531_v3  ;;  %518 = vmatpush3.bf16.msra.mxu1 %v531_v3 }
  0x35   :  { %483 = vmatprep.subr.bf16.mxu0 %v532_v6  ;;  %511 = vmatprep.subr.bf16.mxu1 %v532_v6 }
  0x38   :  { %484 = vmatpush3.bf16.msra.mxu0 %v532_v6  ;;  %519 = vmatpush3.bf16.msra.mxu1 %v532_v6 }
  0x39   :  { %485 = vmatprep.subr.bf16.mxu0 %v533_v7  ;;  %512 = vmatprep.subr.bf16.mxu1 %v533_v7 }
  0x3c   :  { %486 = vmatpush3.bf16.msra.mxu0 %v533_v7  ;;  %520 = vmatpush3.bf16.msra.mxu1 %v533_v7 }
  0x3d   :  { %487 = vmatprep.subr.bf16.mxu0 %v534_v8  ;;  %513 = vmatprep.subr.bf16.mxu1 %v534_v8 }
  0x40   :  { %488 = vmatpush3.bf16.msra.mxu0 %v534_v8  ;;  %521 = vmatpush3.bf16.msra.mxu1 %v534_v8 }
  0x41   :  { %489 = vmatprep.subr.bf16.mxu0 %v535_v9  ;;  %514 = vmatprep.subr.bf16.mxu1 %v535_v9 }
  0x44   :  { %490 = vmatpush3.bf16.msra.mxu0 %v535_v9  ;;  %522 = vmatpush3.bf16.msra.mxu1 %v535_v9 }
  0x47   :  { %492 = vmatmul.mubr.bf16.vlgmr.msra.gmra.mrb[0].mxu0 %v538_v10  ;;  %500 = vmatmul.mubr.bf16.vlgmr.msra.gmra.mrb[0].mxu1 %v539_v11 }
  0x48   :  { %495 = vmatprep.mubr.bf16.mxu0 %v540_v12  ;;  %503 = vmatprep.mubr.bf16.mxu1 %v541_v13 }
  0x4f   :  { %496 = vmatmul.mubr.bf16.gmra.mrb[4].mxu0 %v542_v14  ;;  %504 = vmatmul.mubr.bf16.gmra.mrb[4].mxu1 %v543_v15 }
 0x11a   :  { %v493_v16 = vpop.f32.mrb[0].mxu0  ;;  %v501_v17 = vpop.f32.mrb[0].mxu1 }
 0x11b   :  { %v203_v18 = vpop.f32.mrb[1].mxu0  ;;  %v235_v19 = vpop.f32.mrb[1].mxu1 }
 0x11c   :  { %v494_v20 = vpop.f32.mrb[2].mxu0  ;;  %v502_v21 = vpop.f32.mrb[2].mxu1 }
 0x11d   :  { %v420_v22 = vpack.c.bf16 %v494_v20, %v493_v16  ;;  %v440_v23 = vpack.c.bf16 %v502_v21, %v501_v17  ;;  %v206_v24 = vpop.f32.mrb[3].mxu0  ;;  %v238_v25 = vpop.f32.mrb[3].mxu1 }
 0x11e   :  { %v415_v26 = vpack.c.bf16 %v206_v24, %v203_v18  ;;  %v435_v27 = vpack.c.bf16 %v238_v25, %v235_v19 }
 0x11f   :  { %452 = vst [vmem:[#allocation7 + $0x8] sm:$0xff] %v420_v22   ;;  %456 = vst [vmem:[#allocation7 + $0x28] sm:$0xff] %v440_v23  }
 0x120   :  { %416 = vst [vmem:[#allocation7] sm:$0xff] %v415_v26   ;;  %455 = vst [vmem:[#allocation7 + $0x20] sm:$0xff] %v435_v27  }
 0x122   :  { %v497_v28 = vpop.f32.mrb[4].mxu0  ;;  %v505_v29 = vpop.f32.mrb[4].mxu1 }
 0x123   :  { %v219_v30 = vpop.f32.mrb[5].mxu0  ;;  %v251_v31 = vpop.f32.mrb[5].mxu1 }
 0x124   :  { %v498_v32 = vpop.f32.mrb[6].mxu0  ;;  %v506_v33 = vpop.f32.mrb[6].mxu1 }
 0x125   :  { %v430_v34 = vpack.c.bf16 %v498_v32, %v497_v28  ;;  %v450_v35 = vpack.c.bf16 %v506_v33, %v505_v29  ;;  %v222_v36 = vpop.f32.mrb[7].mxu0  ;;  %v254_v37 = vpop.f32.mrb[7].mxu1 }
 0x126   :  { %v425_v38 = vpack.c.bf16 %v222_v36, %v219_v30  ;;  %v445_v39 = vpack.c.bf16 %v254_v37, %v251_v31 }
 0x127   :  { %454 = vst [vmem:[#allocation7 + $0x18] sm:$0xff] %v430_v34   ;;  %458 = vst [vmem:[#allocation7 + $0x38] sm:$0xff] %v450_v35  }
 0x128   :  { %453 = vst [vmem:[#allocation7 + $0x10] sm:$0xff] %v425_v38   ;;  %457 = vst [vmem:[#allocation7 + $0x30] sm:$0xff] %v445_v39  }
 0x129   :  { %599 = shalt.err (!%p596_p6)
}
 0x12a   :  { %s600_s10 = scalar_lea.hbm %s683_s2, 1024 }
 0x12b   :  { %p601_p7 = scmp.ne.s32.totalorder %s683_s2, %s600_s10  ;;  %p604_p8 = scmp.lt.u32.totalorder %s600_s10, %s683_s2 }
 0x12d   :  { %p606_p9 = pnand %p604_p8, %p601_p7 }
 0x12f   :  { %609 = shalt.err (!%p606_p9)
}
 0x130   :  { %357 = dma.vmem_to_hbm [thread:$0]  %s352_s6, 1024, %s683_s2, [#allocation4], %s617_s19, %s617_s19, %s618_s20  }
 0x131   :  { %614 = dma.done.wait [#allocation4], 1024  }
 0x132   :  { %615 = vsyncadd [#allocation4], 4294966272 }
 0x133   :  { %361 = vsyncpa [#allocation3], 1 }
 0x134   :  { %362 = vsyncpa [#allocation6], 1 }
 0x135   :  { %363 = vsyncpa [#allocation4], 1 }

</bundles_post_ra>
